<compile_context>
chip_gen: v7x
topology: tpu7x:2x2x1
jax: 0.10.0
libtpu: 0.0.40
codegen_flags: <defaults>
</compile_context>

<pallas_src>
import numpy as np
import jax
import jax.numpy as jnp
from jax import lax
from jax.experimental import pallas as pl
from jax.experimental.pallas import tpu as pltpu

OTHER_DIM = 128      # gcn hidden dim
ITEM_SIZE = 128
DNN_SIZE = 256
NUM_CLIPS = 4

_VMEM_LIMIT = 48 * 1024 * 1024   # fits v7x (64 MiB phys) and leaves headroom on v5e/v6e


# ----------------------------------------------------------------------------- helpers

def _round_up(x, m):
    return (x + m - 1) // m * m


def _tile_and_pad(dim, pref, align):
    """Pick a tile (<= pref, `align`-aligned, or full padded dim) and the padded extent."""
    tile = min(pref, _round_up(dim, align))
    return tile, _round_up(dim, tile)


def _pad2d(x, rows, cols):
    r, c = x.shape
    if r == rows and c == cols:
        return x
    return jnp.pad(x, ((0, rows - r), (0, cols - c)))


# ----------------------------------------------------------------------------- kernels

def _clip_em_kernel(cv_ref, tw_ref, o_ref):
    # clip_em = clip_v_em @ trans_w   (bf16 in, f32 accumulate, bf16 out — feeds MXU only)
    o_ref[...] = jnp.dot(cv_ref[...], tw_ref[...],
                         preferred_element_type=jnp.float32).astype(o_ref.dtype)


def clip_em_matmul(clip_v_b, trans_w_b, tc):
    c_pad = clip_v_b.shape[0]
    return pl.pallas_call(
        _clip_em_kernel,
        grid=(c_pad // tc,),
        out_shape=jax.ShapeDtypeStruct((c_pad, OTHER_DIM), jnp.bfloat16),
        in_specs=[pl.BlockSpec((tc, OTHER_DIM), lambda i: (i, 0)),
                  pl.BlockSpec((ITEM_SIZE, ITEM_SIZE), lambda i: (0, 0))],
        out_specs=pl.BlockSpec((tc, OTHER_DIM), lambda i: (i, 0)),
        compiler_params=pltpu.CompilerParams(
            dimension_semantics=("parallel",),
            vmem_limit_bytes=_VMEM_LIMIT),
    )(clip_v_b, trans_w_b)


def _gcn_user_kernel(ap_ref, an_ref, ce_ref, w1_ref, up_ref, un_ref,
                     accp_ref, accn_ref):
    # u_{pos,neg}_emb = relu((A_{pos,neg} @ clip_em) @ W1) — both branches fused,
    # reduction over clip columns on grid axis 1.
    ci = pl.program_id(1)

    @pl.when(ci == 0)
    def _():
        accp_ref[...] = jnp.zeros_like(accp_ref)
        accn_ref[...] = jnp.zeros_like(accn_ref)

    ce = ce_ref[...]
    accp_ref[...] += jnp.dot(ap_ref[...], ce, preferred_element_type=jnp.float32)
    accn_ref[...] += jnp.dot(an_ref[...], ce, preferred_element_type=jnp.float32)

    @pl.when(ci == pl.num_programs(1) - 1)
    def _():
        w1 = w1_ref[...]
        up_ref[...] = jnp.maximum(
            jnp.dot(accp_ref[...].astype(jnp.bfloat16), w1,
                    preferred_element_type=jnp.float32), 0.0)
        un_ref[...] = jnp.maximum(
            jnp.dot(accn_ref[...].astype(jnp.bfloat16), w1,
                    preferred_element_type=jnp.float32), 0.0)


def gcn_user_layer(pos_A_b, neg_A_b, clip_em_b, w1_b, tu, tc):
    u_pad, c_pad = pos_A_b.shape
    out_sd = jax.ShapeDtypeStruct((u_pad, OTHER_DIM), jnp.float32)
    return pl.pallas_call(
        _gcn_user_kernel,
        grid=(u_pad // tu, c_pad // tc),
        out_shape=(out_sd, out_sd),
        in_specs=[pl.BlockSpec((tu, tc), lambda ui, ci: (ui, ci)),
                  pl.BlockSpec((tu, tc), lambda ui, ci: (ui, ci)),
                  pl.BlockSpec((tc, OTHER_DIM), lambda ui, ci: (ci, 0)),
                  pl.BlockSpec((OTHER_DIM, OTHER_DIM), lambda ui, ci: (0, 0))],
        out_specs=(pl.BlockSpec((tu, OTHER_DIM), lambda ui, ci: (ui, 0)),
                   pl.BlockSpec((tu, OTHER_DIM), lambda ui, ci: (ui, 0))),
        scratch_shapes=[pltpu.VMEM((tu, OTHER_DIM), jnp.float32),
                        pltpu.VMEM((tu, OTHER_DIM), jnp.float32)],
        compiler_params=pltpu.CompilerParams(
            dimension_semantics=("parallel", "arbitrary"),
            vmem_limit_bytes=_VMEM_LIMIT),
    )(pos_A_b, neg_A_b, clip_em_b, w1_b)


# contract the row (user) dims of both operands == A.T @ U without materializing A.T
_DOT_T = (((0,), (0,)), ((), ()))


def _gcn_clip_kernel(ap_ref, an_ref, up_ref, un_ref, w2_ref, w_ref,
                     accp_ref, accn_ref):
    # w = (relu((A_pos.T @ u_pos) @ W2) + relu((A_neg.T @ u_neg) @ W2)) / 2
    ui = pl.program_id(1)

    @pl.when(ui == 0)
    def _():
        accp_ref[...] = jnp.zeros_like(accp_ref)
        accn_ref[...] = jnp.zeros_like(accn_ref)

    up = up_ref[...].astype(jnp.bfloat16)
    un = un_ref[...].astype(jnp.bfloat16)
    accp_ref[...] += lax.dot_general(ap_ref[...], up, _DOT_T,
                                     preferred_element_type=jnp.float32)
    accn_ref[...] += lax.dot_general(an_ref[...], un, _DOT_T,
                                     preferred_element_type=jnp.float32)

    @pl.when(ui == pl.num_programs(1) - 1)
    def _():
        w2 = w2_ref[...]
        wp = jnp.maximum(
            jnp.dot(accp_ref[...].astype(jnp.bfloat16), w2,
                    preferred_element_type=jnp.float32), 0.0)
        wn = jnp.maximum(
            jnp.dot(accn_ref[...].astype(jnp.bfloat16), w2,
                    preferred_element_type=jnp.float32), 0.0)
        w_ref[...] = (wp + wn) * 0.5


def gcn_clip_layer(pos_A_b, neg_A_b, u_pos_emb, u_neg_emb, w2_b, tu, tc):
    u_pad, c_pad = pos_A_b.shape
    return pl.pallas_call(
        _gcn_clip_kernel,
        grid=(c_pad // tc, u_pad // tu),
        out_shape=jax.ShapeDtypeStruct((c_pad, OTHER_DIM), jnp.float32),
        in_specs=[pl.BlockSpec((tu, tc), lambda ci, ui: (ui, ci)),
                  pl.BlockSpec((tu, tc), lambda ci, ui: (ui, ci)),
                  pl.BlockSpec((tu, OTHER_DIM), lambda ci, ui: (ui, 0)),
                  pl.BlockSpec((tu, OTHER_DIM), lambda ci, ui: (ui, 0)),
                  pl.BlockSpec((OTHER_DIM, OTHER_DIM), lambda ci, ui: (0, 0))],
        out_specs=pl.BlockSpec((tc, OTHER_DIM), lambda ci, ui: (ci, 0)),
        scratch_shapes=[pltpu.VMEM((tc, OTHER_DIM), jnp.float32),
                        pltpu.VMEM((tc, OTHER_DIM), jnp.float32)],
        compiler_params=pltpu.CompilerParams(
            dimension_semantics=("parallel", "arbitrary"),
            vmem_limit_bytes=_VMEM_LIMIT),
    )(pos_A_b, neg_A_b, u_pos_emb, u_neg_emb, w2_b)


def _mlp_head_kernel(f_ref, w1_ref, b1_ref, w2r_ref, b2_ref, o_ref):
    # sigmoid( relu(F @ W1 + b1) @ w2 + b2 ), with the [256,1] matmul done as a
    # VPU mul + lane reduce, and a lane-dense (rows,128) output block.
    h = jnp.dot(f_ref[...], w1_ref[...], preferred_element_type=jnp.float32) + b1_ref[...]
    h = jnp.maximum(h, 0.0)
    z = jnp.sum(h * w2r_ref[...], axis=-1, keepdims=True) + b2_ref[0]
    o_ref[...] = jnp.broadcast_to(jax.nn.sigmoid(z), o_ref.shape)


def mlp_head_sigmoid(feat, w1, b1, w2, b2):
    rows = feat.shape[0]
    tr, r_pad = _tile_and_pad(max(rows, 1), 256, 8)
    feat_p = _pad2d(feat.astype(jnp.float32), r_pad, 2 * ITEM_SIZE).astype(jnp.bfloat16)
    w1b = w1.astype(jnp.bfloat16)
    b1r = b1.reshape(1, DNN_SIZE).astype(jnp.float32)
    w2r = w2.reshape(1, DNN_SIZE).astype(jnp.float32)   # (256,1) -> row (1,256)
    b2s = b2.reshape(1).astype(jnp.float32)             # scalar bias -> SMEM
    out = pl.pallas_call(
        _mlp_head_kernel,
        grid=(r_pad // tr,),
        out_shape=jax.ShapeDtypeStruct((r_pad, 128), jnp.float32),
        in_specs=[pl.BlockSpec((tr, 2 * ITEM_SIZE), lambda i: (i, 0)),
                  pl.BlockSpec((2 * ITEM_SIZE, DNN_SIZE), lambda i: (0, 0)),
                  pl.BlockSpec((1, DNN_SIZE), lambda i: (0, 0)),
                  pl.BlockSpec((1, DNN_SIZE), lambda i: (0, 0)),
                  pl.BlockSpec(memory_space=pltpu.MemorySpace.SMEM)],
        out_specs=pl.BlockSpec((tr, 128), lambda i: (i, 0)),
        compiler_params=pltpu.CompilerParams(
            dimension_semantics=("parallel",),
            vmem_limit_bytes=_VMEM_LIMIT),
    )(feat_p, w1b, b1r, w2r, b2s)
    return out[:rows, 0:1]


# ----------------------------------------------------------------------------- forward

def cliprec_forward_train(params, pos_A, neg_A, batch, total_u_id_list, total_v_id_list):
    """Mirrors Cliprec.forward(batch, train_step=True)."""
    u_num, clip_total = pos_A.shape

    # tile sizes and zero padding (zeros are exact for these matmul/relu chains)
    tu, u_pad = _tile_and_pad(u_num, 512, 8)
    tc, c_pad = _tile_and_pad(clip_total, 512, 128)

    pos_A_b = _pad2d(pos_A.astype(jnp.float32), u_pad, c_pad).astype(jnp.bfloat16)
    neg_A_b = _pad2d(neg_A.astype(jnp.float32), u_pad, c_pad).astype(jnp.bfloat16)
    clip_v_b = _pad2d(params["clip_v_em"], c_pad, OTHER_DIM).astype(jnp.bfloat16)
    trans_w_b = params["trans_w"].astype(jnp.bfloat16)
    gcn_w1_b = params["gcn_w1"].astype(jnp.bfloat16)
    gcn_w2_b = params["gcn_w2"].astype(jnp.bfloat16)

    # ---- GCN (Pallas kernels) ----
    clip_em = clip_em_matmul(clip_v_b, trans_w_b, tc)                               # [c_pad,128] bf16
    u_pos_emb_p, u_neg_emb_p = gcn_user_layer(pos_A_b, neg_A_b, clip_em, gcn_w1_b, tu, tc)
    w_p = gcn_clip_layer(pos_A_b, neg_A_b, u_pos_emb_p, u_neg_emb_p, gcn_w2_b, tu, tc)

    u_pos_emb = u_pos_emb_p[:u_num]
    u_neg_emb = u_neg_emb_p[:u_num]
    w = w_p[:clip_total]

    # ---- host-side (numpy) label / lookup / ragged-gather glue, as in the torch code ----
    uid = np.asarray(batch["uid"])
    vid = np.asarray(batch["vid"])
    label = np.stack([np.asarray(batch["label"][i]) for i in range(NUM_CLIPS)], axis=1)

    u_idx = np.array([int(np.where(total_u_id_list == u)[0][0]) for u in uid])
    u_pos_em = u_pos_emb[u_idx]
    u_neg_em = u_neg_emb[u_idx]

    num_valid_clips, reshape_label = [], []
    for j in range(label.shape[0]):
        zeros = np.where(label[j] == 0)[0]
        if len(zeros) == 0:
            num_valid_clips.append(NUM_CLIPS)
            reshape_label += [1] * NUM_CLIPS
        else:
            num_valid_clips.append(int(zeros[0]) + 1)
            reshape_label += [1] * int(zeros[0]) + [0]

    up_rows, clip_rows, loss_w = [], [], []
    for k, nvc in enumerate(num_valid_clips):
        v_idx = int(np.where(total_v_id_list == int(vid[k]))[0][0])
        for m in range(nvc):
            up_rows.append(k)
            clip_rows.append(v_idx * NUM_CLIPS + m)
            loss_w.append(float(batch["label_weight"][k]))

    up_rows = np.asarray(up_rows, dtype=np.int32)
    u_pos_matrix = u_pos_em[up_rows]
    clip_gcn = w[np.asarray(clip_rows, dtype=np.int32)]
    loss_weight = jnp.asarray(loss_w, dtype=jnp.float32)
    reshape_label = jnp.asarray(reshape_label, dtype=jnp.int32)

    # ---- second ranking branch (ragged, host-side) ----
    up2_rows, pos2_list, neg2_rows = [], [], []
    for k, nvc in enumerate(num_valid_clips):
        if nvc < 2:
            continue
        zeros = np.where(label[k] == 0)[0]
        if len(zeros) == 0:
            continue
        v_idx = int(np.where(total_v_id_list == int(vid[k]))[0][0])
        start = v_idx * NUM_CLIPS
        up2_rows.append(k)
        pos2_list.append(jnp.mean(w[start:start + nvc - 1], axis=0, keepdims=True))
        neg2_rows.append(start + nvc - 1)

    n2 = len(up2_rows)
    # ---- MLP heads (single batched Pallas call; the torch w3/b3/w4/b4 "negative"
    #      heads are computed-and-discarded dead work and are therefore omitted) ----
    feat_pos = jnp.concatenate([clip_gcn, u_pos_matrix], axis=1)
    r1 = feat_pos.shape[0]
    if n2 > 0:
        up2_rows = np.asarray(up2_rows, dtype=np.int32)
        u_pos_matrix2 = u_pos_em[up2_rows]
        clip_gcn_pos2 = jnp.concatenate(pos2_list, axis=0)
        clip_gcn_neg2 = w[np.asarray(neg2_rows, dtype=np.int32)]
        feat2 = jnp.concatenate([clip_gcn_pos2, u_pos_matrix2], axis=1)
        feat3 = jnp.concatenate([clip_gcn_neg2, u_pos_matrix2], axis=1)
        feat_all = jnp.concatenate([feat_pos, feat2, feat3], axis=0)
    else:
        feat_all = feat_pos

    head = mlp_head_sigmoid(feat_all, params["w1"], params["b1"],
                            params["w2"], params["b2"])

    output = head[:r1]
    if n2 > 0:
        output2 = head[r1:r1 + n2]
        output3 = head[r1 + n2:r1 + 2 * n2]
    else:
        output2 = jnp.zeros((0, 1), jnp.float32)
        output3 = jnp.zeros((0, 1), jnp.float32)

    # TODO(synk): eval branch (train_step=False) aggregation with agg_w not included here.
    return output, loss_weight, reshape_label, output2, output3


# ----------------------------------------------------------------------------- setup

def xavier_normal(key, shape):
    fan_in, fan_out = shape[0], shape[1]
    std = float(np.sqrt(2.0 / (fan_in + fan_out)))
    return (std * jax.random.normal(key, shape)).astype(jnp.float32)


def init_params(key, clip_total_num):
    ks = jax.random.split(key, 8)
    return {
        "clip_v_em": (0.1 * jax.random.normal(ks[0], (clip_total_num, OTHER_DIM))).astype(jnp.float32),
        "trans_w": xavier_normal(ks[1], (ITEM_SIZE, ITEM_SIZE)),
        "gcn_w1": xavier_normal(ks[2], (OTHER_DIM, OTHER_DIM)),
        "gcn_w2": xavier_normal(ks[3], (OTHER_DIM, OTHER_DIM)),
        "w1": xavier_normal(ks[4], (ITEM_SIZE * 2, DNN_SIZE)),
        "b1": jnp.zeros((DNN_SIZE,), jnp.float32),
        "w2": xavier_normal(ks[5], (DNN_SIZE, 1)),
        "b2": jnp.zeros((1,), jnp.float32),
        "w3": xavier_normal(ks[6], (ITEM_SIZE * 2, DNN_SIZE)),
        "b3": jnp.zeros((DNN_SIZE,), jnp.float32),
        "w4": xavier_normal(ks[7], (DNN_SIZE, 1)),
        "b4": jnp.zeros((1,), jnp.float32),
    }


if __name__ == "__main__":
    key = jax.random.PRNGKey(0)

    u_num = 8
    video_num = 4
    clip_total_num = NUM_CLIPS * video_num          # 16
    total_u_id_list = np.array([100, 101, 102, 103, 104, 105, 106, 107])
    total_v_id_list = np.array([1000, 1001, 1002, 1003])

    k_param, k_pa, k_na = jax.random.split(key, 3)
    params = init_params(k_param, clip_total_num)
    pos_A = jax.random.uniform(k_pa, (u_num, clip_total_num), dtype=jnp.float32)
    neg_A = jax.random.uniform(k_na, (u_num, clip_total_num), dtype=jnp.float32)

    # batch of 2 users; label[i][j] = label of clip i for sample j
    #   sample 0 labels per clip: [1, 1, 0, 1]  -> 3 valid clips
    #   sample 1 labels per clip: [1, 0, 1, 1]  -> 2 valid clips
    batch = {
        "uid": np.array([103, 101]),
        "vid": np.array([1002, 1001]),
        "label": [np.array([1, 1]), np.array([1, 0]), np.array([0, 1]), np.array([1, 1])],
        "label_weight": np.array([0.5, 1.0], dtype=np.float32),
    }

    outs = cliprec_forward_train(params, pos_A, neg_A, batch,
                                 total_u_id_list, total_v_id_list)
    outs = jax.block_until_ready(outs)

    output, loss_weight, reshape_label, output2, output3 = outs
    assert output.shape == (5, 1)
    assert loss_weight.shape == (5,)
    assert reshape_label.shape == (5,)
    assert output2.shape == (2, 1)
    assert output3.shape == (2, 1)
    assert bool(jnp.all(jnp.isfinite(output)))
    assert bool(jnp.all(jnp.isfinite(output2)))
    assert bool(jnp.all(jnp.isfinite(output3)))
    print("KERNEL_OK")
</pallas_src>

<mosaic_0001>
module attributes {stable_mosaic.version = 11 : i64} {
  func.func @_clip_em_kernel(%arg0: i32, %arg1: memref<128x128xbf16, #tpu.memory_space<vmem>>, %arg2: memref<128x128xbf16, #tpu.memory_space<vmem>>, %arg3: memref<128x128xbf16, #tpu.memory_space<vmem>>) attributes {dimension_semantics = [#tpu.dimension_semantics<parallel>], iteration_bounds = array<i64: 1>, scalar_prefetch = 0 : i64, scratch_operands = 0 : i64, tpu.core_type = #tpu.core_type<tc>, window_params = [{transform_indices = @transform_0, window_bounds = array<i64: 128, 128>}, {pipeline_mode = #tpu.pipeline_mode<synchronous>, transform_indices = @transform_1, window_bounds = array<i64: 128, 128>}, {transform_indices = @transform_2, window_bounds = array<i64: 128, 128>}]} {
    %c0 = arith.constant 0 : index
    %c0_0 = arith.constant 0 : index
    %0 = vector.load %arg1[%c0, %c0_0] : memref<128x128xbf16, #tpu.memory_space<vmem>>, vector<128x128xbf16>
    %c0_1 = arith.constant 0 : index
    %c0_2 = arith.constant 0 : index
    %1 = vector.load %arg2[%c0_1, %c0_2] : memref<128x128xbf16, #tpu.memory_space<vmem>>, vector<128x128xbf16>
    %cst = arith.constant dense<0.000000e+00> : vector<128x128xf32>
    %2 = tpu.matmul %0, %1, %cst {dimension_numbers = #tpu.dot_dimension_numbers<[1], [0], [0], [1], [0, 0, 1, 1], [], []>} : vector<128x128xbf16>, vector<128x128xbf16>, vector<128x128xf32> -> vector<128x128xf32>
    %3 = arith.truncf %2 : vector<128x128xf32> to vector<128x128xbf16>
    %c0_3 = arith.constant 0 : index
    %c0_4 = arith.constant 0 : index
    %4 = vector.load %arg3[%c0_3, %c0_4] : memref<128x128xbf16, #tpu.memory_space<vmem>>, vector<128x128xbf16>
    tpu.vector_store %arg3[%c0_3, %c0_4], %3 {strides = array<i32>} : memref<128x128xbf16, #tpu.memory_space<vmem>>, vector<128x128xbf16>,
    return
  }
  func.func @transform_0(%arg0: i32) -> (i32, i32) {
    %c0_i32 = arith.constant 0 : i32
    %c0_i32_0 = arith.constant 0 : i32
    return %arg0, %c0_i32 : i32, i32
  }
  func.func @transform_1(%arg0: i32) -> (i32, i32) {
    %c0_i32 = arith.constant 0 : i32
    %c0_i32_0 = arith.constant 0 : i32
    %c0_i32_1 = arith.constant 0 : i32
    return %c0_i32, %c0_i32_0 : i32, i32
  }
  func.func @transform_2(%arg0: i32) -> (i32, i32) {
    %c0_i32 = arith.constant 0 : i32
    %c0_i32_0 = arith.constant 0 : i32
    return %arg0, %c0_i32 : i32, i32
  }
}

</mosaic_0001>

<bundles_post_ra>
// kernel: tpu_custom_call.1
= control target key start
LH: loop header
LB: loop body
LE: loop exit
PB: predicated region body
PF: predicated region fallthrough
CT: control target
= control target key end

     0   :  { %7 = vsyncpa [#allocation3], 0  ;;  %s681_s0 = inlined_call_operand.hbm [shape: bf16[128,128], index: 0, kind: input, shape index: {}]   ;;  %s682_s1 = inlined_call_operand.hbm [shape: bf16[128,128], index: 1, kind: input, shape index: {}]   ;;  %s683_s2 = inlined_call_operand.hbm [shape: bf16[128,128], index: 2, kind: output, shape index: {}]  }
   0x1   :  { %8 = vsyncpa [#allocation6], 0 }
   0x2   :  { %9 = vsyncpa [#allocation4], 0  ;;  %s616_s9 = smov [#allocation2]   ;;  %s544_s13 = scalar_lea.hbm %s681_s0, 1024 }
   0x3   :  { %s15_s10 = sshll.u32 %s616_s9, 4  ;;  %p545_p0 = scmp.ne.s32.totalorder %s681_s0, %s544_s13  ;;  %s16_s10 = int_to_ptr.vmem [resolvable:$true] %s15_s10 }
   0x4   :  { %p548_p1 = scmp.lt.u32.totalorder %s544_s13, %s681_s0 }
   0x6   :  { %p550_p2 = pnand %p548_p1, %p545_p0 }
   0x8   :  { %553 = shalt.err (!%p550_p2)
}
   0x9   :  { %s554_s18 = scalar_lea.vmem %s16_s10, 1024  ;;  %p559_p4 = scmp.lt.s32.totalorder %s16_s10, %s16_s10 }
   0xa   :  { %p555_p3 = scmp.ne.s32.totalorder %s16_s10, %s554_s18  ;;  %p560_p5 = scmp.lt.s32.totalorder %s554_s18, %s554_s18 }
   0xc   :  { %p561_p6 = por %p560_p5, %p559_p4 }
   0xe   :  { %p562_p7 = pnand %p561_p6, %p555_p3 }
  0x10   :  { %565 = shalt.err (!%p562_p7)
}
  0x11   :  { %s617_s19 = smov 64   ;;  %s618_s20 = smov 4  }
  0x12   :  { %21 = dma.hbm_to_vmem [thread:$0]  %s681_s0, 1024, %s16_s10, [#allocation3], %s617_s19, %s617_s19, %s618_s20  }
  0x13   :  { %s619_s23 = smov [#allocation5]   ;;  %s566_s27 = scalar_lea.hbm %s682_s1, 1024 }
  0x14   :  { %s27_s24 = sshll.u32 %s619_s23, 4  ;;  %p567_p8 = scmp.ne.s32.totalorder %s682_s1, %s566_s27  ;;  %s28_s24 = int_to_ptr.vmem [resolvable:$true] %s27_s24 }
  0x15   :  { %p570_p9 = scmp.lt.u32.totalorder %s566_s27, %s682_s1 }
  0x17   :  { %p572_p10 = pnand %p570_p9, %p567_p8 }
  0x19   :  { %575 = shalt.err (!%p572_p10)
}
  0x1a   :  { %s576_s4 = scalar_lea.vmem %s28_s24, 1024  ;;  %p581_p12 = scmp.lt.s32.totalorder %s28_s24, %s28_s24 }
  0x1b   :  { %p577_p11 = scmp.ne.s32.totalorder %s28_s24, %s576_s4  ;;  %p582_p13 = scmp.lt.s32.totalorder %s576_s4, %s576_s4 }
  0x1d   :  { %p583_p0 = por %p582_p13, %p581_p12 }
  0x1f   :  { %p584_p1 = pnand %p583_p0, %p577_p11 }
  0x21   :  { %587 = shalt.err (!%p584_p1)
}
  0x22   :  { %33 = dma.hbm_to_vmem [thread:$0]  %s682_s1, 1024, %s28_s24, [#allocation6], %s617_s19, %s617_s19, %s618_s20  }
  0x23   :  { %610 = dma.done.wait [#allocation3], 1024  }
  0x24   :  { %611 = vsyncadd [#allocation3], 4294966272 }
  0x25   :  { %612 = dma.done.wait [#allocation6], 1024  }
  0x26   :  { %613 = vsyncadd [#allocation6], 4294966272  ;;  %v528_v0 = vld [vmem:[#allocation5] sm:$0xff]   ;;  %v529_v1 = vld [vmem:[#allocation5 + $0x8] sm:$0xff]   ;;  %s620_s1 = smov [#allocation7]  }
  0x27   :  { %475 = vmatprep.subr.bf16.mxu0 %v528_v0  ;;  %507 = vmatprep.subr.bf16.mxu1 %v528_v0  ;;  %v530_v2 = vld [vmem:[#allocation5 + $0x10] sm:$0xff]   ;;  %v531_v3 = vld [vmem:[#allocation5 + $0x18] sm:$0xff]   ;;  %v536_v4 = vld [vmem:[#allocation2] sm:$0xff]   ;;  %s351_s6 = sshll.u32 %s620_s1, 4  ;;  %s352_s6 = int_to_ptr.vmem [resolvable:$true] %s351_s6 }
  0x28   :  { %476 = vmatpush3.bf16.msra.mxu0 %v528_v0  ;;  %515 = vmatpush3.bf16.msra.mxu1 %v528_v0  ;;  %v537_v5 = vld [vmem:[#allocation2 + $0x20] sm:$0xff]   ;;  %v533_v7 = vld [vmem:[#allocation5 + $0x28] sm:$0xff]   ;;  %v534_v8 = vld [vmem:[#allocation5 + $0x30] sm:$0xff]   ;;  %s588_s7 = scalar_lea.vmem %s352_s6, 1024  ;;  %p593_p3 = scmp.lt.s32.totalorder %s352_s6, %s352_s6 }
  0x29   :  { %477 = vmatprep.subr.bf16.mxu0 %v529_v1  ;;  %508 = vmatprep.subr.bf16.mxu1 %v529_v1  ;;  %v532_v6 = vld [vmem:[#allocation5 + $0x20] sm:$0xff]   ;;  %v535_v9 = vld [vmem:[#allocation5 + $0x38] sm:$0xff]   ;;  %v538_v10 = vld [vmem:[#allocation2 + $0x8] sm:$0xff]   ;;  %p589_p2 = scmp.ne.s32.totalorder %s352_s6, %s588_s7  ;;  %p594_p4 = scmp.lt.s32.totalorder %s588_s7, %s588_s7 }
  0x2a   :  { %491 = vmatprep.mubr.bf16.mxu0 %v536_v4  ;;  %499 = vmatprep.mubr.bf16.mxu1 %v537_v5  ;;  %v539_v11 = vld [vmem:[#allocation2 + $0x28] sm:$0xff]   ;;  %v540_v12 = vld [vmem:[#allocation2 + $0x10] sm:$0xff]   ;;  %v542_v14 = vld [vmem:[#allocation2 + $0x18] sm:$0xff]  }
  0x2b   :  { %v541_v13 = vld [vmem:[#allocation2 + $0x30] sm:$0xff]   ;;  %v543_v15 = vld [vmem:[#allocation2 + $0x38] sm:$0xff]   ;;  %p595_p5 = por %p594_p4, %p593_p3 }
  0x2c   :  { %478 = vmatpush3.bf16.msra.mxu0 %v529_v1  ;;  %516 = vmatpush3.bf16.msra.mxu1 %v529_v1 }
  0x2d   :  { %479 = vmatprep.subr.bf16.mxu0 %v530_v2  ;;  %509 = vmatprep.subr.bf16.mxu1 %v530_v2  ;;  %p596_p6 = pnand %p595_p5, %p589_p2 }
  0x30   :  { %480 = vmatpush3.bf16.msra.mxu0 %v530_v2  ;;  %517 = vmatpush3.bf16.msra.mxu1 %v530_v2 }
  0x31   :  { %481 = vmatprep.subr.bf16.mxu0 %v531_v3  ;;  %510 = vmatprep.subr.bf16.mxu1 %v531_v3 }
  0x34   :  { %482 = vmatpush3.bf16.msra.mxu0 %v531_v3  ;;  %518 = vmatpush3.bf16.msra.mxu1 %v531_v3 }
  0x35   :  { %483 = vmatprep.subr.bf16.mxu0 %v532_v6  ;;  %511 = vmatprep.subr.bf16.mxu1 %v532_v6 }
  0x38   :  { %484 = vmatpush3.bf16.msra.mxu0 %v532_v6  ;;  %519 = vmatpush3.bf16.msra.mxu1 %v532_v6 }
  0x39   :  { %485 = vmatprep.subr.bf16.mxu0 %v533_v7  ;;  %512 = vmatprep.subr.bf16.mxu1 %v533_v7 }
  0x3c   :  { %486 = vmatpush3.bf16.msra.mxu0 %v533_v7  ;;  %520 = vmatpush3.bf16.msra.mxu1 %v533_v7 }
  0x3d   :  { %487 = vmatprep.subr.bf16.mxu0 %v534_v8  ;;  %513 = vmatprep.subr.bf16.mxu1 %v534_v8 }
  0x40   :  { %488 = vmatpush3.bf16.msra.mxu0 %v534_v8  ;;  %521 = vmatpush3.bf16.msra.mxu1 %v534_v8 }
  0x41   :  { %489 = vmatprep.subr.bf16.mxu0 %v535_v9  ;;  %514 = vmatprep.subr.bf16.mxu1 %v535_v9 }
  0x44   :  { %490 = vmatpush3.bf16.msra.mxu0 %v535_v9  ;;  %522 = vmatpush3.bf16.msra.mxu1 %v535_v9 }
  0x47   :  { %492 = vmatmul.mubr.bf16.vlgmr.msra.gmra.mrb[0].mxu0 %v538_v10  ;;  %500 = vmatmul.mubr.bf16.vlgmr.msra.gmra.mrb[0].mxu1 %v539_v11 }
  0x48   :  { %495 = vmatprep.mubr.bf16.mxu0 %v540_v12  ;;  %503 = vmatprep.mubr.bf16.mxu1 %v541_v13 }
  0x4f   :  { %496 = vmatmul.mubr.bf16.gmra.mrb[4].mxu0 %v542_v14  ;;  %504 = vmatmul.mubr.bf16.gmra.mrb[4].mxu1 %v543_v15 }
 0x11a   :  { %v493_v16 = vpop.f32.mrb[0].mxu0  ;;  %v501_v17 = vpop.f32.mrb[0].mxu1 }
 0x11b   :  { %v203_v18 = vpop.f32.mrb[1].mxu0  ;;  %v235_v19 = vpop.f32.mrb[1].mxu1 }
 0x11c   :  { %v494_v20 = vpop.f32.mrb[2].mxu0  ;;  %v502_v21 = vpop.f32.mrb[2].mxu1 }
 0x11d   :  { %v420_v22 = vpack.c.bf16 %v494_v20, %v493_v16  ;;  %v440_v23 = vpack.c.bf16 %v502_v21, %v501_v17  ;;  %v206_v24 = vpop.f32.mrb[3].mxu0  ;;  %v238_v25 = vpop.f32.mrb[3].mxu1 }
 0x11e   :  { %v415_v26 = vpack.c.bf16 %v206_v24, %v203_v18  ;;  %v435_v27 = vpack.c.bf16 %v238_v25, %v235_v19 }
 0x11f   :  { %452 = vst [vmem:[#allocation7 + $0x8] sm:$0xff] %v420_v22   ;;  %456 = vst [vmem:[#allocation7 + $0x28] sm:$0xff] %v440_v23  }
 0x120   :  { %416 = vst [vmem:[#allocation7] sm:$0xff] %v415_v26   ;;  %455 = vst [vmem:[#allocation7 + $0x20] sm:$0xff] %v435_v27  }
 0x122   :  { %v497_v28 = vpop.f32.mrb[4].mxu0  ;;  %v505_v29 = vpop.f32.mrb[4].mxu1 }
 0x123   :  { %v219_v30 = vpop.f32.mrb[5].mxu0  ;;  %v251_v31 = vpop.f32.mrb[5].mxu1 }
 0x124   :  { %v498_v32 = vpop.f32.mrb[6].mxu0  ;;  %v506_v33 = vpop.f32.mrb[6].mxu1 }
 0x125   :  { %v430_v34 = vpack.c.bf16 %v498_v32, %v497_v28  ;;  %v450_v35 = vpack.c.bf16 %v506_v33, %v505_v29  ;;  %v222_v36 = vpop.f32.mrb[7].mxu0  ;;  %v254_v37 = vpop.f32.mrb[7].mxu1 }
 0x126   :  { %v425_v38 = vpack.c.bf16 %v222_v36, %v219_v30  ;;  %v445_v39 = vpack.c.bf16 %v254_v37, %v251_v31 }
 0x127   :  { %454 = vst [vmem:[#allocation7 + $0x18] sm:$0xff] %v430_v34   ;;  %458 = vst [vmem:[#allocation7 + $0x38] sm:$0xff] %v450_v35  }
 0x128   :  { %453 = vst [vmem:[#allocation7 + $0x10] sm:$0xff] %v425_v38   ;;  %457 = vst [vmem:[#allocation7 + $0x30] sm:$0xff] %v445_v39  }
 0x129   :  { %599 = shalt.err (!%p596_p6)
}
 0x12a   :  { %s600_s10 = scalar_lea.hbm %s683_s2, 1024 }
 0x12b   :  { %p601_p7 = scmp.ne.s32.totalorder %s683_s2, %s600_s10  ;;  %p604_p8 = scmp.lt.u32.totalorder %s600_s10, %s683_s2 }
 0x12d   :  { %p606_p9 = pnand %p604_p8, %p601_p7 }
 0x12f   :  { %609 = shalt.err (!%p606_p9)
}
 0x130   :  { %357 = dma.vmem_to_hbm [thread:$0]  %s352_s6, 1024, %s683_s2, [#allocation4], %s617_s19, %s617_s19, %s618_s20  }
 0x131   :  { %614 = dma.done.wait [#allocation4], 1024  }
 0x132   :  { %615 = vsyncadd [#allocation4], 4294966272 }
 0x133   :  { %361 = vsyncpa [#allocation3], 1 }
 0x134   :  { %362 = vsyncpa [#allocation6], 1 }
 0x135   :  { %363 = vsyncpa [#allocation4], 1 }

</bundles_post_ra>
